<compile_context>
chip_gen: v7x
topology: tpu7x:2x2x1
jax: 0.10.0
libtpu: 0.0.40
codegen_flags: <defaults>
</compile_context>

<pallas_src>
import math

import jax
import jax.numpy as jnp
from jax.experimental import pallas as pl
from jax.experimental.pallas import tpu as pltpu


def _round_up(x, m):
    return ((x + m - 1) // m) * m


def _mlp_kernel(x_ref,
                w1_ref, b1_ref,
                w2_ref, b2_ref,
                w3_ref, b3_ref,
                w4_ref, b4_ref,
                o_ref):
    # Every dot: bf16 x bf16 operands -> f32 MXU accumulation; bias/ReLU in f32.
    h = jnp.dot(x_ref[...].astype(jnp.bfloat16), w1_ref[...],
                preferred_element_type=jnp.float32)
    h = jnp.maximum(h + b1_ref[...], 0.0)

    h = jnp.dot(h.astype(jnp.bfloat16), w2_ref[...],
                preferred_element_type=jnp.float32)
    h = jnp.maximum(h + b2_ref[...], 0.0)

    h = jnp.dot(h.astype(jnp.bfloat16), w3_ref[...],
                preferred_element_type=jnp.float32)
    h = jnp.maximum(h + b3_ref[...], 0.0)

    out = jnp.dot(h.astype(jnp.bfloat16), w4_ref[...],
                  preferred_element_type=jnp.float32)
    o_ref[...] = (out + b4_ref[...]).astype(o_ref.dtype)


def _choose_tiles(B, tile_m):
    """Balanced batch tiling: minimal padding, tm a multiple of 8, and an even
    number of tiles (when >1) so v7x's two TensorCores stay load-balanced."""
    if B <= tile_m:
        # One tile for tiny batches; two once there is enough work to split
        # across v7x's two TensorCores.
        n_tiles = 2 if B >= 256 else 1
    else:
        n_tiles = pl.cdiv(B, tile_m)
        if n_tiles > 1 and n_tiles % 2:
            n_tiles += 1
    tm = max(8, _round_up(pl.cdiv(B, n_tiles), 8))
    return tm, n_tiles


def mlp_forward_padded(x, params, tile_m=1024, single_buffer_weights=True):
    """Fused 4-layer MLP; returns the padded (B_pad, n_out_pad) f32 output.

    Callers that want to avoid an extra HBM pass over the output should consume
    this buffer directly (slice / argmax over [:, :n_actions]) inside their own
    jit instead of materializing a sliced copy."""
    x = x.reshape(x.shape[0], -1)            # torch.flatten(x, start_dim=1)
    B = x.shape[0]
    n_states_pad = params["w1"].shape[0]     # multiple of 8   (K of layer 1)
    n_out_pad = params["w4"].shape[1]        # multiple of 128 (lane-dense out)

    if x.shape[1] != n_states_pad:
        x = jnp.pad(x, ((0, 0), (0, n_states_pad - x.shape[1])))

    tm, n_tiles = _choose_tiles(B, tile_m)
    B_pad = tm * n_tiles
    if B_pad != B:
        x = jnp.pad(x, ((0, B_pad - B), (0, 0)))

    weight_args = (params["w1"], params["b1"],
                   params["w2"], params["b2"],
                   params["w3"], params["b3"],
                   params["w4"], params["b4"])

    # Constant index_map: each weight/bias is DMA'd once and stays VMEM-resident
    # across the whole grid.  Their block never changes, so single-buffer them.
    w_kwargs = {"pipeline_mode": pl.Buffered(1)} if single_buffer_weights else {}
    in_specs = [pl.BlockSpec((tm, n_states_pad), lambda i: (i, 0))]
    for w in weight_args:
        in_specs.append(pl.BlockSpec(w.shape, lambda i: (0, 0), **w_kwargs))

    return pl.pallas_call(
        _mlp_kernel,
        out_shape=jax.ShapeDtypeStruct((B_pad, n_out_pad), jnp.float32),
        grid=(n_tiles,),
        in_specs=in_specs,
        out_specs=pl.BlockSpec((tm, n_out_pad), lambda i: (i, 0)),
        compiler_params=pltpu.CompilerParams(
            dimension_semantics=("parallel",),   # batch tiles split across TCs (v7x)
        ),
    )(x, *weight_args)


def mlp_forward(x, params, n_actions, tile_m=1024, single_buffer_weights=True):
    """Convenience wrapper returning (B, n_actions).  Call it inside your own jit
    so the slice fuses with the consumer instead of paying a second HBM pass."""
    out = mlp_forward_padded(x, params, tile_m=tile_m,
                             single_buffer_weights=single_buffer_weights)
    return out[:x.shape[0], :n_actions]


def init_mlp_params(key, n_states, n_actions, hidden_dim=128):
    """nn.Linear-style U(-1/sqrt(fan_in), 1/sqrt(fan_in)) init.  Weights stored
    transposed as (in, out) in bfloat16 (MXU-native); biases stay f32.  Feature
    dims are zero-padded once (n_states -> mult of 8, n_actions -> mult of 128)
    so the sliced outputs are exact."""
    n_states_pad = max(8, _round_up(n_states, 8))
    n_out_pad = max(128, _round_up(n_actions, 128))

    dims = [(n_states, hidden_dim, n_states_pad, hidden_dim),
            (hidden_dim, hidden_dim, hidden_dim, hidden_dim),
            (hidden_dim, hidden_dim, hidden_dim, hidden_dim),
            (hidden_dim, n_actions, hidden_dim, n_out_pad)]

    params = {}
    for i, (fan_in, fan_out, in_pad, out_pad) in enumerate(dims, start=1):
        key, kw, kb = jax.random.split(key, 3)
        bound = 1.0 / math.sqrt(fan_in)
        w = jax.random.uniform(kw, (fan_in, fan_out), jnp.float32,
                               minval=-bound, maxval=bound)
        b = jax.random.uniform(kb, (1, fan_out), jnp.float32,
                               minval=-bound, maxval=bound)
        params[f"w{i}"] = jnp.pad(w.astype(jnp.bfloat16),
                                  ((0, in_pad - fan_in), (0, out_pad - fan_out)))
        params[f"b{i}"] = jnp.pad(b, ((0, 0), (0, out_pad - fan_out)))
    return params


def _reference(x, params, n_actions):
    """Pure-JAX reference replicating the kernel's bf16-matmul / f32-accumulate
    numerics (padded weight rows/cols are zero, so real outputs are exact)."""
    x = x.reshape(x.shape[0], -1)
    n_states_pad = params["w1"].shape[0]
    h = jnp.pad(x, ((0, 0), (0, n_states_pad - x.shape[1])))
    for i in (1, 2, 3):
        h = jnp.dot(h.astype(jnp.bfloat16), params[f"w{i}"],
                    preferred_element_type=jnp.float32)
        h = jnp.maximum(h + params[f"b{i}"], 0.0)
    out = jnp.dot(h.astype(jnp.bfloat16), params["w4"],
                  preferred_element_type=jnp.float32) + params["b4"]
    return out[:, :n_actions]


if __name__ == "__main__":
    key = jax.random.PRNGKey(0)
    n_states, n_actions, hidden_dim = 4, 6, 128

    kp, kx, kx2 = jax.random.split(key, 3)
    params = init_mlp_params(kp, n_states, n_actions, hidden_dim)

    fwd = jax.jit(mlp_forward,
                  static_argnames=("n_actions", "tile_m", "single_buffer_weights"))

    # Small per-step batch (single sublane-aligned tile, grid of 1).
    x_small = jax.random.normal(kx, (2, n_states), jnp.float32)
    ref_small = _reference(x_small, params, n_actions)

    single_buf = True
    try:
        out_small = jax.block_until_ready(
            fwd(x_small, params, n_actions=n_actions, single_buffer_weights=True))
        assert jnp.allclose(out_small, ref_small, atol=2e-3, rtol=2e-3)
    except Exception:
        # Fallback: this Pallas build rejects single-buffered (Buffered(1)) weight
        # operands in pallas_call; default double-buffering only costs ~70 KB VMEM.
        single_buf = False
        out_small = jax.block_until_ready(
            fwd(x_small, params, n_actions=n_actions, single_buffer_weights=False))
        assert jnp.allclose(out_small, ref_small, atol=2e-3, rtol=2e-3)
    assert out_small.shape == (2, n_actions)

    # Replay-style batch exercising the balanced multi-tile path
    # (B=300 -> 2 tiles of tm=152, B_pad=304; both v7x TCs busy).
    x_big = jax.random.normal(kx2, (300, n_states), jnp.float32)
    out_big = jax.block_until_ready(
        fwd(x_big, params, n_actions=n_actions, single_buffer_weights=single_buf))
    ref_big = _reference(x_big, params, n_actions)
    assert out_big.shape == (300, n_actions)
    assert jnp.allclose(out_big, ref_big, atol=2e-3, rtol=2e-3)

    print("KERNEL_OK")
</pallas_src>

<mosaic_0001>
module attributes {stable_mosaic.version = 11 : i64} {
  func.func @_mlp_kernel(%arg0: i32, %arg1: memref<8x8xf32, #tpu.memory_space<vmem>>, %arg2: memref<8x128xbf16, #tpu.memory_space<vmem>>, %arg3: memref<1x128xf32, #tpu.memory_space<vmem>>, %arg4: memref<128x128xbf16, #tpu.memory_space<vmem>>, %arg5: memref<1x128xf32, #tpu.memory_space<vmem>>, %arg6: memref<128x128xbf16, #tpu.memory_space<vmem>>, %arg7: memref<1x128xf32, #tpu.memory_space<vmem>>, %arg8: memref<128x128xbf16, #tpu.memory_space<vmem>>, %arg9: memref<1x128xf32, #tpu.memory_space<vmem>>, %arg10: memref<8x128xf32, #tpu.memory_space<vmem>>) attributes {dimension_semantics = [#tpu.dimension_semantics<parallel>], iteration_bounds = array<i64: 1>, scalar_prefetch = 0 : i64, scratch_operands = 0 : i64, tpu.core_type = #tpu.core_type<tc>, window_params = [{transform_indices = @transform_0, window_bounds = array<i64: 8, 8>}, {pipeline_mode = #tpu.pipeline_mode<synchronous>, transform_indices = @transform_1, window_bounds = array<i64: 8, 128>}, {pipeline_mode = #tpu.pipeline_mode<synchronous>, transform_indices = @transform_2, window_bounds = array<i64: 1, 128>}, {pipeline_mode = #tpu.pipeline_mode<synchronous>, transform_indices = @transform_3, window_bounds = array<i64: 128, 128>}, {pipeline_mode = #tpu.pipeline_mode<synchronous>, transform_indices = @transform_4, window_bounds = array<i64: 1, 128>}, {pipeline_mode = #tpu.pipeline_mode<synchronous>, transform_indices = @transform_5, window_bounds = array<i64: 128, 128>}, {pipeline_mode = #tpu.pipeline_mode<synchronous>, transform_indices = @transform_6, window_bounds = array<i64: 1, 128>}, {pipeline_mode = #tpu.pipeline_mode<synchronous>, transform_indices = @transform_7, window_bounds = array<i64: 128, 128>}, {pipeline_mode = #tpu.pipeline_mode<synchronous>, transform_indices = @transform_8, window_bounds = array<i64: 1, 128>}, {transform_indices = @transform_9, window_bounds = array<i64: 8, 128>}]} {
    %c0 = arith.constant 0 : index
    %c0_0 = arith.constant 0 : index
    %0 = vector.load %arg1[%c0, %c0_0] : memref<8x8xf32, #tpu.memory_space<vmem>>, vector<8x8xf32>
    %1 = arith.truncf %0 : vector<8x8xf32> to vector<8x8xbf16>
    %c0_1 = arith.constant 0 : index
    %c0_2 = arith.constant 0 : index
    %2 = vector.load %arg2[%c0_1, %c0_2] : memref<8x128xbf16, #tpu.memory_space<vmem>>, vector<8x128xbf16>
    %cst = arith.constant dense<0.000000e+00> : vector<8x128xf32>
    %3 = tpu.matmul %1, %2, %cst {dimension_numbers = #tpu.dot_dimension_numbers<[1], [0], [0], [1], [0, 0, 1, 1], [], []>} : vector<8x8xbf16>, vector<8x128xbf16>, vector<8x128xf32> -> vector<8x128xf32>
    %c0_3 = arith.constant 0 : index
    %c0_4 = arith.constant 0 : index
    %4 = vector.load %arg3[%c0_3, %c0_4] : memref<1x128xf32, #tpu.memory_space<vmem>>, vector<1x128xf32>
    %5 = vector.broadcast %4 : vector<1x128xf32> to vector<8x128xf32>
    %6 = arith.addf %3, %5 : vector<8x128xf32>
    %cst_5 = arith.constant 0.000000e+00 : f32
    %7 = vector.broadcast %cst_5 : f32 to vector<8x128xf32>
    %8 = arith.maximumf %6, %7 : vector<8x128xf32>
    %9 = arith.truncf %8 : vector<8x128xf32> to vector<8x128xbf16>
    %c0_6 = arith.constant 0 : index
    %c0_7 = arith.constant 0 : index
    %10 = vector.load %arg4[%c0_6, %c0_7] : memref<128x128xbf16, #tpu.memory_space<vmem>>, vector<128x128xbf16>
    %cst_8 = arith.constant dense<0.000000e+00> : vector<8x128xf32>
    %11 = tpu.matmul %9, %10, %cst_8 {dimension_numbers = #tpu.dot_dimension_numbers<[1], [0], [0], [1], [0, 0, 1, 1], [], []>} : vector<8x128xbf16>, vector<128x128xbf16>, vector<8x128xf32> -> vector<8x128xf32>
    %c0_9 = arith.constant 0 : index
    %c0_10 = arith.constant 0 : index
    %12 = vector.load %arg5[%c0_9, %c0_10] : memref<1x128xf32, #tpu.memory_space<vmem>>, vector<1x128xf32>
    %13 = vector.broadcast %12 : vector<1x128xf32> to vector<8x128xf32>
    %14 = arith.addf %11, %13 : vector<8x128xf32>
    %cst_11 = arith.constant 0.000000e+00 : f32
    %15 = vector.broadcast %cst_11 : f32 to vector<8x128xf32>
    %16 = arith.maximumf %14, %15 : vector<8x128xf32>
    %17 = arith.truncf %16 : vector<8x128xf32> to vector<8x128xbf16>
    %c0_12 = arith.constant 0 : index
    %c0_13 = arith.constant 0 : index
    %18 = vector.load %arg6[%c0_12, %c0_13] : memref<128x128xbf16, #tpu.memory_space<vmem>>, vector<128x128xbf16>
    %cst_14 = arith.constant dense<0.000000e+00> : vector<8x128xf32>
    %19 = tpu.matmul %17, %18, %cst_14 {dimension_numbers = #tpu.dot_dimension_numbers<[1], [0], [0], [1], [0, 0, 1, 1], [], []>} : vector<8x128xbf16>, vector<128x128xbf16>, vector<8x128xf32> -> vector<8x128xf32>
    %c0_15 = arith.constant 0 : index
    %c0_16 = arith.constant 0 : index
    %20 = vector.load %arg7[%c0_15, %c0_16] : memref<1x128xf32, #tpu.memory_space<vmem>>, vector<1x128xf32>
    %21 = vector.broadcast %20 : vector<1x128xf32> to vector<8x128xf32>
    %22 = arith.addf %19, %21 : vector<8x128xf32>
    %cst_17 = arith.constant 0.000000e+00 : f32
    %23 = vector.broadcast %cst_17 : f32 to vector<8x128xf32>
    %24 = arith.maximumf %22, %23 : vector<8x128xf32>
    %25 = arith.truncf %24 : vector<8x128xf32> to vector<8x128xbf16>
    %c0_18 = arith.constant 0 : index
    %c0_19 = arith.constant 0 : index
    %26 = vector.load %arg8[%c0_18, %c0_19] : memref<128x128xbf16, #tpu.memory_space<vmem>>, vector<128x128xbf16>
    %cst_20 = arith.constant dense<0.000000e+00> : vector<8x128xf32>
    %27 = tpu.matmul %25, %26, %cst_20 {dimension_numbers = #tpu.dot_dimension_numbers<[1], [0], [0], [1], [0, 0, 1, 1], [], []>} : vector<8x128xbf16>, vector<128x128xbf16>, vector<8x128xf32> -> vector<8x128xf32>
    %c0_21 = arith.constant 0 : index
    %c0_22 = arith.constant 0 : index
    %28 = vector.load %arg9[%c0_21, %c0_22] : memref<1x128xf32, #tpu.memory_space<vmem>>, vector<1x128xf32>
    %29 = vector.broadcast %28 : vector<1x128xf32> to vector<8x128xf32>
    %30 = arith.addf %27, %29 : vector<8x128xf32>
    %c0_23 = arith.constant 0 : index
    %c0_24 = arith.constant 0 : index
    %31 = vector.load %arg10[%c0_23, %c0_24] : memref<8x128xf32, #tpu.memory_space<vmem>>, vector<8x128xf32>
    tpu.vector_store %arg10[%c0_23, %c0_24], %30 {strides = array<i32>} : memref<8x128xf32, #tpu.memory_space<vmem>>, vector<8x128xf32>,
    return
  }
  func.func @transform_0(%arg0: i32) -> (i32, i32) {
    %c0_i32 = arith.constant 0 : i32
    %c0_i32_0 = arith.constant 0 : i32
    return %arg0, %c0_i32 : i32, i32
  }
  func.func @transform_1(%arg0: i32) -> (i32, i32) {
    %c0_i32 = arith.constant 0 : i32
    %c0_i32_0 = arith.constant 0 : i32
    %c0_i32_1 = arith.constant 0 : i32
    return %c0_i32, %c0_i32_0 : i32, i32
  }
  func.func @transform_2(%arg0: i32) -> (i32, i32) {
    %c0_i32 = arith.constant 0 : i32
    %c0_i32_0 = arith.constant 0 : i32
    %c0_i32_1 = arith.constant 0 : i32
    return %c0_i32, %c0_i32_0 : i32, i32
  }
  func.func @transform_3(%arg0: i32) -> (i32, i32) {
    %c0_i32 = arith.constant 0 : i32
    %c0_i32_0 = arith.constant 0 : i32
    %c0_i32_1 = arith.constant 0 : i32
    return %c0_i32, %c0_i32_0 : i32, i32
  }
  func.func @transform_4(%arg0: i32) -> (i32, i32) {
    %c0_i32 = arith.constant 0 : i32
    %c0_i32_0 = arith.constant 0 : i32
    %c0_i32_1 = arith.constant 0 : i32
    return %c0_i32, %c0_i32_0 : i32, i32
  }
  func.func @transform_5(%arg0: i32) -> (i32, i32) {
    %c0_i32 = arith.constant 0 : i32
    %c0_i32_0 = arith.constant 0 : i32
    %c0_i32_1 = arith.constant 0 : i32
    return %c0_i32, %c0_i32_0 : i32, i32
  }
  func.func @transform_6(%arg0: i32) -> (i32, i32) {
    %c0_i32 = arith.constant 0 : i32
    %c0_i32_0 = arith.constant 0 : i32
    %c0_i32_1 = arith.constant 0 : i32
    return %c0_i32, %c0_i32_0 : i32, i32
  }
  func.func @transform_7(%arg0: i32) -> (i32, i32) {
    %c0_i32 = arith.constant 0 : i32
    %c0_i32_0 = arith.constant 0 : i32
    %c0_i32_1 = arith.constant 0 : i32
    return %c0_i32, %c0_i32_0 : i32, i32
  }
  func.func @transform_8(%arg0: i32) -> (i32, i32) {
    %c0_i32 = arith.constant 0 : i32
    %c0_i32_0 = arith.constant 0 : i32
    %c0_i32_1 = arith.constant 0 : i32
    return %c0_i32, %c0_i32_0 : i32, i32
  }
  func.func @transform_9(%arg0: i32) -> (i32, i32) {
    %c0_i32 = arith.constant 0 : i32
    %c0_i32_0 = arith.constant 0 : i32
    return %arg0, %c0_i32 : i32, i32
  }
}

module attributes {stable_mosaic.version = 11 : i64} {
  func.func @_mlp_kernel(%arg0: i32, %arg1: memref<8x8xf32, #tpu.memory_space<vmem>>, %arg2: memref<8x128xbf16, #tpu.memory_space<vmem>>, %arg3: memref<1x128xf32, #tpu.memory_space<vmem>>, %arg4: memref<128x128xbf16, #tpu.memory_space<vmem>>, %arg5: memref<1x128xf32, #tpu.memory_space<vmem>>, %arg6: memref<128x128xbf16, #tpu.memory_space<vmem>>, %arg7: memref<1x128xf32, #tpu.memory_space<vmem>>, %arg8: memref<128x128xbf16, #tpu.memory_space<vmem>>, %arg9: memref<1x128xf32, #tpu.memory_space<vmem>>, %arg10: memref<8x128xf32, #tpu.memory_space<vmem>>) attributes {dimension_semantics = [#tpu.dimension_semantics<parallel>], iteration_bounds = array<i64: 1>, scalar_prefetch = 0 : i64, scratch_operands = 0 : i64, tpu.core_type = #tpu.core_type<tc>, window_params = [{transform_indices = @transform_0, window_bounds = array<i64: 8, 8>}, {pipeline_mode = #tpu.pipeline_mode<synchronous>, transform_indices = @transform_1, window_bounds = array<i64: 8, 128>}, {pipeline_mode = #tpu.pipeline_mode<synchronous>, transform_indices = @transform_2, window_bounds = array<i64: 1, 128>}, {pipeline_mode = #tpu.pipeline_mode<synchronous>, transform_indices = @transform_3, window_bounds = array<i64: 128, 128>}, {pipeline_mode = #tpu.pipeline_mode<synchronous>, transform_indices = @transform_4, window_bounds = array<i64: 1, 128>}, {pipeline_mode = #tpu.pipeline_mode<synchronous>, transform_indices = @transform_5, window_bounds = array<i64: 128, 128>}, {pipeline_mode = #tpu.pipeline_mode<synchronous>, transform_indices = @transform_6, window_bounds = array<i64: 1, 128>}, {pipeline_mode = #tpu.pipeline_mode<synchronous>, transform_indices = @transform_7, window_bounds = array<i64: 128, 128>}, {pipeline_mode = #tpu.pipeline_mode<synchronous>, transform_indices = @transform_8, window_bounds = array<i64: 1, 128>}, {transform_indices = @transform_9, window_bounds = array<i64: 8, 128>}]} {
    %c0 = arith.constant 0 : index
    %c0_0 = arith.constant 0 : index
    %0 = vector.load %arg1[%c0, %c0_0] : memref<8x8xf32, #tpu.memory_space<vmem>>, vector<8x8xf32>
    %1 = arith.truncf %0 : vector<8x8xf32> to vector<8x8xbf16>
    %c0_1 = arith.constant 0 : index
    %c0_2 = arith.constant 0 : index
    %2 = vector.load %arg2[%c0_1, %c0_2] : memref<8x128xbf16, #tpu.memory_space<vmem>>, vector<8x128xbf16>
    %cst = arith.constant dense<0.000000e+00> : vector<8x128xf32>
    %3 = tpu.matmul %1, %2, %cst {dimension_numbers = #tpu.dot_dimension_numbers<[1], [0], [0], [1], [0, 0, 1, 1], [], []>} : vector<8x8xbf16>, vector<8x128xbf16>, vector<8x128xf32> -> vector<8x128xf32>
    %c0_3 = arith.constant 0 : index
    %c0_4 = arith.constant 0 : index
    %4 = vector.load %arg3[%c0_3, %c0_4] : memref<1x128xf32, #tpu.memory_space<vmem>>, vector<1x128xf32>
    %5 = vector.broadcast %4 : vector<1x128xf32> to vector<8x128xf32>
    %6 = arith.addf %3, %5 : vector<8x128xf32>
    %cst_5 = arith.constant 0.000000e+00 : f32
    %7 = vector.broadcast %cst_5 : f32 to vector<8x128xf32>
    %8 = arith.maximumf %6, %7 : vector<8x128xf32>
    %9 = arith.truncf %8 : vector<8x128xf32> to vector<8x128xbf16>
    %c0_6 = arith.constant 0 : index
    %c0_7 = arith.constant 0 : index
    %10 = vector.load %arg4[%c0_6, %c0_7] : memref<128x128xbf16, #tpu.memory_space<vmem>>, vector<128x128xbf16>
    %cst_8 = arith.constant dense<0.000000e+00> : vector<8x128xf32>
    %11 = tpu.matmul %9, %10, %cst_8 {dimension_numbers = #tpu.dot_dimension_numbers<[1], [0], [0], [1], [0, 0, 1, 1], [], []>} : vector<8x128xbf16>, vector<128x128xbf16>, vector<8x128xf32> -> vector<8x128xf32>
    %c0_9 = arith.constant 0 : index
    %c0_10 = arith.constant 0 : index
    %12 = vector.load %arg5[%c0_9, %c0_10] : memref<1x128xf32, #tpu.memory_space<vmem>>, vector<1x128xf32>
    %13 = vector.broadcast %12 : vector<1x128xf32> to vector<8x128xf32>
    %14 = arith.addf %11, %13 : vector<8x128xf32>
    %cst_11 = arith.constant 0.000000e+00 : f32
    %15 = vector.broadcast %cst_11 : f32 to vector<8x128xf32>
    %16 = arith.maximumf %14, %15 : vector<8x128xf32>
    %17 = arith.truncf %16 : vector<8x128xf32> to vector<8x128xbf16>
    %c0_12 = arith.constant 0 : index
    %c0_13 = arith.constant 0 : index
    %18 = vector.load %arg6[%c0_12, %c0_13] : memref<128x128xbf16, #tpu.memory_space<vmem>>, vector<128x128xbf16>
    %cst_14 = arith.constant dense<0.000000e+00> : vector<8x128xf32>
    %19 = tpu.matmul %17, %18, %cst_14 {dimension_numbers = #tpu.dot_dimension_numbers<[1], [0], [0], [1], [0, 0, 1, 1], [], []>} : vector<8x128xbf16>, vector<128x128xbf16>, vector<8x128xf32> -> vector<8x128xf32>
    %c0_15 = arith.constant 0 : index
    %c0_16 = arith.constant 0 : index
    %20 = vector.load %arg7[%c0_15, %c0_16] : memref<1x128xf32, #tpu.memory_space<vmem>>, vector<1x128xf32>
    %21 = vector.broadcast %20 : vector<1x128xf32> to vector<8x128xf32>
    %22 = arith.addf %19, %21 : vector<8x128xf32>
    %cst_17 = arith.constant 0.000000e+00 : f32
    %23 = vector.broadcast %cst_17 : f32 to vector<8x128xf32>
    %24 = arith.maximumf %22, %23 : vector<8x128xf32>
    %25 = arith.truncf %24 : vector<8x128xf32> to vector<8x128xbf16>
    %c0_18 = arith.constant 0 : index
    %c0_19 = arith.constant 0 : index
    %26 = vector.load %arg8[%c0_18, %c0_19] : memref<128x128xbf16, #tpu.memory_space<vmem>>, vector<128x128xbf16>
    %cst_20 = arith.constant dense<0.000000e+00> : vector<8x128xf32>
    %27 = tpu.matmul %25, %26, %cst_20 {dimension_numbers = #tpu.dot_dimension_numbers<[1], [0], [0], [1], [0, 0, 1, 1], [], []>} : vector<8x128xbf16>, vector<128x128xbf16>, vector<8x128xf32> -> vector<8x128xf32>
    %c0_21 = arith.constant 0 : index
    %c0_22 = arith.constant 0 : index
    %28 = vector.load %arg9[%c0_21, %c0_22] : memref<1x128xf32, #tpu.memory_space<vmem>>, vector<1x128xf32>
    %29 = vector.broadcast %28 : vector<1x128xf32> to vector<8x128xf32>
    %30 = arith.addf %27, %29 : vector<8x128xf32>
    %c0_23 = arith.constant 0 : index
    %c0_24 = arith.constant 0 : index
    %31 = vector.load %arg10[%c0_23, %c0_24] : memref<8x128xf32, #tpu.memory_space<vmem>>, vector<8x128xf32>
    tpu.vector_store %arg10[%c0_23, %c0_24], %30 {strides = array<i32>} : memref<8x128xf32, #tpu.memory_space<vmem>>, vector<8x128xf32>,
    return
  }
  func.func @transform_0(%arg0: i32) -> (i32, i32) {
    %c0_i32 = arith.constant 0 : i32
    %c0_i32_0 = arith.constant 0 : i32
    return %arg0, %c0_i32 : i32, i32
  }
  func.func @transform_1(%arg0: i32) -> (i32, i32) {
    %c0_i32 = arith.constant 0 : i32
    %c0_i32_0 = arith.constant 0 : i32
    %c0_i32_1 = arith.constant 0 : i32
    return %c0_i32, %c0_i32_0 : i32, i32
  }
  func.func @transform_2(%arg0: i32) -> (i32, i32) {
    %c0_i32 = arith.constant 0 : i32
    %c0_i32_0 = arith.constant 0 : i32
    %c0_i32_1 = arith.constant 0 : i32
    return %c0_i32, %c0_i32_0 : i32, i32
  }
  func.func @transform_3(%arg0: i32) -> (i32, i32) {
    %c0_i32 = arith.constant 0 : i32
    %c0_i32_0 = arith.constant 0 : i32
    %c0_i32_1 = arith.constant 0 : i32
    return %c0_i32, %c0_i32_0 : i32, i32
  }
  func.func @transform_4(%arg0: i32) -> (i32, i32) {
    %c0_i32 = arith.constant 0 : i32
    %c0_i32_0 = arith.constant 0 : i32
    %c0_i32_1 = arith.constant 0 : i32
    return %c0_i32, %c0_i32_0 : i32, i32
  }
  func.func @transform_5(%arg0: i32) -> (i32, i32) {
    %c0_i32 = arith.constant 0 : i32
    %c0_i32_0 = arith.constant 0 : i32
    %c0_i32_1 = arith.constant 0 : i32
    return %c0_i32, %c0_i32_0 : i32, i32
  }
  func.func @transform_6(%arg0: i32) -> (i32, i32) {
    %c0_i32 = arith.constant 0 : i32
    %c0_i32_0 = arith.constant 0 : i32
    %c0_i32_1 = arith.constant 0 : i32
    return %c0_i32, %c0_i32_0 : i32, i32
  }
  func.func @transform_7(%arg0: i32) -> (i32, i32) {
    %c0_i32 = arith.constant 0 : i32
    %c0_i32_0 = arith.constant 0 : i32
    %c0_i32_1 = arith.constant 0 : i32
    return %c0_i32, %c0_i32_0 : i32, i32
  }
  func.func @transform_8(%arg0: i32) -> (i32, i32) {
    %c0_i32 = arith.constant 0 : i32
    %c0_i32_0 = arith.constant 0 : i32
    %c0_i32_1 = arith.constant 0 : i32
    return %c0_i32, %c0_i32_0 : i32, i32
  }
  func.func @transform_9(%arg0: i32) -> (i32, i32) {
    %c0_i32 = arith.constant 0 : i32
    %c0_i32_0 = arith.constant 0 : i32
    return %arg0, %c0_i32 : i32, i32
  }
}

</mosaic_0001>

<bundles_post_ra>
// kernel: mlp_forward.1
= control target key start
LH: loop header
LB: loop body
LE: loop exit
PB: predicated region body
PF: predicated region fallthrough
CT: control target
= control target key end

     0   :  { %14 = vsyncpa [#allocation3], 0  ;;  %s866_s0 = inlined_call_operand.vmem [shape: f32[8,8], index: 0, kind: input, shape index: {}]   ;;  %s867_s1 = inlined_call_operand.vmem [shape: bf16[8,128], index: 1, kind: input, shape index: {}]   ;;  %s868_s2 = inlined_call_operand.vmem [shape: f32[1,128], index: 2, kind: input, shape index: {}]   ;;  %s869_s3 = inlined_call_operand.hbm [shape: bf16[128,128], index: 3, kind: input, shape index: {}]   ;;  %s870_s4 = inlined_call_operand.vmem [shape: f32[1,128], index: 4, kind: input, shape index: {}]   ;;  %s871_s5 = inlined_call_operand.hbm [shape: bf16[128,128], index: 5, kind: input, shape index: {}]   ;;  %s872_s6 = inlined_call_operand.vmem [shape: f32[1,128], index: 6, kind: input, shape index: {}]   ;;  %s873_s7 = inlined_call_operand.hbm [shape: bf16[128,128], index: 7, kind: input, shape index: {}]   ;;  %s874_s8 = inlined_call_operand.vmem [shape: f32[1,128], index: 8, kind: input, shape index: {}]   ;;  %s875_s9 = inlined_call_operand.vmem [shape: f32[8,128], index: 9, kind: output, shape index: {}]  }
   0x1   :  { %15 = vsyncpa [#allocation5], 0  ;;  %s703_s30 = smov [#allocation4]   ;;  %s704_s11 = smov [#allocation2]  }
   0x2   :  { %s41_s10 = sshll.u32 %s703_s30, 4  ;;  %s27_s12 = sshll.u32 %s704_s11, 4  ;;  %s42_s10 = int_to_ptr.vmem [resolvable:$true] %s41_s10  ;;  %s760_s12 = int_to_ptr.vmem [resolvable:$true] %s27_s12 }
   0x3   :  { %s633_s15 = scalar_lea.hbm %s871_s5, 1024 }
   0x4   :  { %p634_p0 = scmp.ne.s32.totalorder %s871_s5, %s633_s15  ;;  %p637_p1 = scmp.lt.u32.totalorder %s633_s15, %s871_s5 }
   0x6   :  { %p639_p2 = pnand %p637_p1, %p634_p0 }
   0x8   :  { %642 = shalt.err (!%p639_p2)
}
   0x9   :  { %s643_s20 = scalar_lea.vmem %s42_s10, 1024  ;;  %p648_p4 = scmp.lt.s32.totalorder %s42_s10, %s42_s10 }
   0xa   :  { %p644_p3 = scmp.ne.s32.totalorder %s42_s10, %s643_s20  ;;  %p649_p5 = scmp.lt.s32.totalorder %s643_s20, %s643_s20 }
   0xc   :  { %p650_p6 = por %p649_p5, %p648_p4 }
   0xe   :  { %p651_p7 = pnand %p650_p6, %p644_p3 }
  0x10   :  { %654 = shalt.err (!%p651_p7)
}
  0x11   :  { %s705_s21 = smov 64   ;;  %s706_s22 = smov 4  }
  0x12   :  { %47 = dma.hbm_to_vmem [thread:$0]  %s871_s5, 1024, %s42_s10, [#allocation5], %s705_s21, %s705_s21, %s706_s22  }
  0x13   :  { %s655_s27 = scalar_lea.hbm %s869_s3, 1024 }
  0x14   :  { %p656_p8 = scmp.ne.s32.totalorder %s869_s3, %s655_s27  ;;  %p659_p9 = scmp.lt.u32.totalorder %s655_s27, %s869_s3 }
  0x16   :  { %p661_p10 = pnand %p659_p9, %p656_p8 }
  0x18   :  { %664 = shalt.err (!%p661_p10)
}
  0x19   :  { %s665_s13 = scalar_lea.vmem %s760_s12, 1024  ;;  %p670_p12 = scmp.lt.s32.totalorder %s760_s12, %s760_s12 }
  0x1a   :  { %p666_p11 = scmp.ne.s32.totalorder %s760_s12, %s665_s13  ;;  %p671_p13 = scmp.lt.s32.totalorder %s665_s13, %s665_s13 }
  0x1c   :  { %p672_p0 = por %p671_p13, %p670_p12 }
  0x1e   :  { %p673_p1 = pnand %p672_p0, %p666_p11 }
  0x20   :  { %676 = shalt.err (!%p673_p1)
}
  0x21   :  { %33 = dma.hbm_to_vmem [thread:$0]  %s869_s3, 1024, %s760_s12, [#allocation3], %s705_s21, %s705_s21, %s706_s22  }
  0x22   :  { %s707_s14 = smov [#allocation6]   ;;  %s677_s18 = scalar_lea.hbm %s873_s7, 1024 }
  0x23   :  { %s55_s15 = sshll.u32 %s707_s14, 4  ;;  %p678_p2 = scmp.ne.s32.totalorder %s873_s7, %s677_s18  ;;  %s56_s15 = int_to_ptr.vmem [resolvable:$true] %s55_s15 }
  0x24   :  { %p681_p3 = scmp.lt.u32.totalorder %s677_s18, %s873_s7 }
  0x26   :  { %p683_p4 = pnand %p681_p3, %p678_p2 }
  0x28   :  { %686 = shalt.err (!%p683_p4)
}
  0x29   :  { %s687_s25 = scalar_lea.vmem %s56_s15, 1024  ;;  %p692_p6 = scmp.lt.s32.totalorder %s56_s15, %s56_s15 }
  0x2a   :  { %p688_p5 = scmp.ne.s32.totalorder %s56_s15, %s687_s25  ;;  %p693_p7 = scmp.lt.s32.totalorder %s687_s25, %s687_s25 }
  0x2c   :  { %p694_p8 = por %p693_p7, %p692_p6 }
  0x2e   :  { %p695_p9 = pnand %p694_p8, %p688_p5 }
  0x30   :  { %698 = shalt.err (!%p695_p9)
}
  0x31   :  { %61 = dma.hbm_to_vmem [thread:$0]  %s873_s7, 1024, %s56_s15, [#allocation5], %s705_s21, %s705_s21, %s706_s22  }
  0x32   :  { %699 = dma.done.wait [#allocation3], 1024  }
  0x33   :  { %700 = vsyncadd [#allocation3], 4294966272 }
  0x34   :  { %701 = dma.done.wait [#allocation5], 2048  }
  0x35   :  { %702 = vsyncadd [#allocation5], 4294965248  ;;  %v708_v0 = vmov 0.0   ;;  %vm709_vm0 = vmmov 0   ;;  %vm88_vm1 = vcmask 1043456   ;;  %v74_v2 = vld [vmem:[%s866_s0] sm:$0xff] }
  0x36   :  { %536 = vmatprep.subr.bf16.mxu0 %v708_v0  ;;  %538 = vmatprep.mubr.msk.bf16.mxu0 %vm709_vm0, %v708_v0  ;;  %v76_v1 = vld [vmem:[%s867_s1] sm:$0xf]  ;;  %v75_v4 = vpack.c.bf16 %v74_v2, %v74_v2  ;;  %vm84_vm2 = vcmask 64512   ;;  %v610_v6 = vld [vmem:[#allocation2 + $0x8] sm:$0xff]   ;;  %v611_v7 = vld [vmem:[#allocation2 + $0x10] sm:$0xff]  }
  0x37   :  { %542 = vmatprep.subr.bf16.mxu1 %v708_v0  ;;  %558 = vmatprep.mubr.msk.bf16.mxu1 %vm709_vm0, %v708_v0  ;;  %v90_v3 = vsel %vm88_vm1, %v76_v1, 0  ;;  %v609_v5 = vld [vmem:[#allocation2] sm:$0xff]   ;;  %v612_v8 = vld [vmem:[#allocation2 + $0x18] sm:$0xff]   ;;  %v614_v10 = vld [vmem:[#allocation2 + $0x28] sm:$0xff]  }
  0x38   :  { %537 = vmatpush3.bf16.msra.mxu0 %v90_v3  ;;  %543 = vmatpush3.bf16.msra.mxu1 %v609_v5  ;;  %v613_v9 = vld [vmem:[#allocation2 + $0x20] sm:$0xff]   ;;  %v615_v11 = vld [vmem:[#allocation2 + $0x30] sm:$0xff]   ;;  %v616_v12 = vld [vmem:[#allocation2 + $0x38] sm:$0xff]  }
  0x39   :  { %562 = vmatprep.subr.bf16.mxu0 %v708_v0  ;;  %544 = vmatprep.subr.bf16.mxu1 %v708_v0  ;;  %v617_v13 = vld [vmem:[#allocation4] sm:$0xff]   ;;  %v618_v14 = vld [vmem:[#allocation4 + $0x8] sm:$0xff]   ;;  %v619_v15 = vld [vmem:[#allocation4 + $0x10] sm:$0xff]  }
  0x3a   :  { %v620_v16 = vld [vmem:[#allocation4 + $0x18] sm:$0xff]   ;;  %v621_v17 = vld [vmem:[#allocation4 + $0x20] sm:$0xff]   ;;  %v622_v18 = vld [vmem:[#allocation4 + $0x28] sm:$0xff]  }
  0x3b   :  { %539 = vmatmul.mubr.msk.bf16.vlgmr.msra.gmra.mrb[0].mxu0 %vm84_vm2, %v75_v4  ;;  %v478_v19 = vld [vmem:[%s868_s2] ss:$0 sm:$0xff]  ;;  %v623_v27 = vld [vmem:[#allocation4 + $0x30] sm:$0xff]   ;;  %v624_v28 = vld [vmem:[#allocation4 + $0x38] sm:$0xff]  }
  0x3c   :  { %578 = vmatprep.mubr.msk.bf16.mxu0 %vm709_vm0, %v708_v0  ;;  %545 = vmatpush3.bf16.msra.mxu1 %v610_v6  ;;  %v625_v29 = vld [vmem:[#allocation6] sm:$0xff]   ;;  %v626_v30 = vld [vmem:[#allocation6 + $0x8] sm:$0xff]   ;;  %v627_v31 = vld [vmem:[#allocation6 + $0x10] sm:$0xff]  }
  0x3d   :  { %546 = vmatprep.subr.bf16.mxu1 %v708_v0  ;;  %563 = vmatpush3.bf16.msra.mxu0 %v617_v13  ;;  %v628_v32 = vld [vmem:[#allocation6 + $0x18] sm:$0xff]   ;;  %v629_v33 = vld [vmem:[#allocation6 + $0x20] sm:$0xff]   ;;  %v630_v34 = vld [vmem:[#allocation6 + $0x28] sm:$0xff]  }
  0x3e   :  { %564 = vmatprep.subr.bf16.mxu0 %v708_v0  ;;  %v480_v35 = vld [vmem:[%s870_s4] ss:$0 sm:$0xff]  ;;  %v631_v43 = vld [vmem:[#allocation6 + $0x30] sm:$0xff]   ;;  %v632_v44 = vld [vmem:[#allocation6 + $0x38] sm:$0xff]  }
  0x3f   :  { %v489_v45 = vld [vmem:[%s872_s6] ss:$0 sm:$0xff] }
  0x40   :  { %547 = vmatpush3.bf16.msra.mxu1 %v611_v7  ;;  %v498_v53 = vld [vmem:[%s874_s8] ss:$0 sm:$0xff] }
  0x41   :  { %548 = vmatprep.subr.bf16.mxu1 %v708_v0  ;;  %565 = vmatpush3.bf16.msra.mxu0 %v618_v14 }
  0x42   :  { %566 = vmatprep.subr.bf16.mxu0 %v708_v0 }
  0x44   :  { %549 = vmatpush3.bf16.msra.mxu1 %v612_v8 }
  0x45   :  { %550 = vmatprep.subr.bf16.mxu1 %v708_v0  ;;  %567 = vmatpush3.bf16.msra.mxu0 %v619_v15 }
  0x46   :  { %568 = vmatprep.subr.bf16.mxu0 %v708_v0 }
  0x48   :  { %551 = vmatpush3.bf16.msra.mxu1 %v613_v9 }
  0x49   :  { %552 = vmatprep.subr.bf16.mxu1 %v708_v0  ;;  %569 = vmatpush3.bf16.msra.mxu0 %v620_v16 }
  0x4a   :  { %570 = vmatprep.subr.bf16.mxu0 %v708_v0 }
  0x4c   :  { %553 = vmatpush3.bf16.msra.mxu1 %v614_v10 }
  0x4d   :  { %554 = vmatprep.subr.bf16.mxu1 %v708_v0  ;;  %571 = vmatpush3.bf16.msra.mxu0 %v621_v17 }
  0x4e   :  { %572 = vmatprep.subr.bf16.mxu0 %v708_v0 }
  0x50   :  { %555 = vmatpush3.bf16.msra.mxu1 %v615_v11 }
  0x51   :  { %556 = vmatprep.subr.bf16.mxu1 %v708_v0  ;;  %573 = vmatpush3.bf16.msra.mxu0 %v622_v18 }
  0x52   :  { %574 = vmatprep.subr.bf16.mxu0 %v708_v0 }
  0x54   :  { %557 = vmatpush3.bf16.msra.mxu1 %v616_v12 }
  0x55   :  { %582 = vmatprep.subr.bf16.mxu1 %v708_v0  ;;  %575 = vmatpush3.bf16.msra.mxu0 %v623_v27 }
  0x56   :  { %576 = vmatprep.subr.bf16.mxu0 %v708_v0 }
  0x59   :  { %577 = vmatpush3.bf16.msra.mxu0 %v624_v28 }
 0x10e   :  { %v126_v20 = vpop.f32.mrb[0].mxu0 }
 0x10f   :  { %v127_v21 = vadd.f32 %v478_v19, %v126_v20  ;;  %v540_v22 = vpop.f32.mrb[1].mxu0 }
 0x110   :  { %v129_v23 = vpop.f32.mrb[2].mxu0 }
 0x111   :  { %v132_v24 = vmax.f32 %v127_v21, 0.0  ;;  %v541_v25 = vpop.f32.mrb[3].mxu0 }
 0x113   :  { %v133_v26 = vpack.c.bf16 %v132_v24, %v132_v24 }
 0x115   :  { %559 = vmatmul.mubr.bf16.vlgmr.msra.gmra.mrb[0].mxu1 %v133_v26 }
 0x116   :  { %598 = vmatprep.mubr.msk.bf16.mxu1 %vm709_vm0, %v708_v0  ;;  %583 = vmatpush3.bf16.msra.mxu1 %v625_v29 }
 0x117   :  { %584 = vmatprep.subr.bf16.mxu1 %v708_v0 }
 0x11a   :  { %585 = vmatpush3.bf16.msra.mxu1 %v626_v30 }
 0x11b   :  { %586 = vmatprep.subr.bf16.mxu1 %v708_v0 }
 0x11e   :  { %587 = vmatpush3.bf16.msra.mxu1 %v627_v31 }
 0x11f   :  { %588 = vmatprep.subr.bf16.mxu1 %v708_v0 }
 0x122   :  { %589 = vmatpush3.bf16.msra.mxu1 %v628_v32 }
 0x123   :  { %590 = vmatprep.subr.bf16.mxu1 %v708_v0 }
 0x126   :  { %591 = vmatpush3.bf16.msra.mxu1 %v629_v33 }
 0x127   :  { %592 = vmatprep.subr.bf16.mxu1 %v708_v0 }
 0x12a   :  { %593 = vmatpush3.bf16.msra.mxu1 %v630_v34 }
 0x12b   :  { %594 = vmatprep.subr.bf16.mxu1 %v708_v0 }
 0x12e   :  { %595 = vmatpush3.bf16.msra.mxu1 %v631_v43 }
 0x12f   :  { %596 = vmatprep.subr.bf16.mxu1 %v708_v0 }
 0x132   :  { %597 = vmatpush3.bf16.msra.mxu1 %v632_v44 }
 0x1e8   :  { %v239_v36 = vpop.f32.mrb[0].mxu1 }
 0x1e9   :  { %v240_v37 = vadd.f32 %v480_v35, %v239_v36  ;;  %v560_v38 = vpop.f32.mrb[1].mxu1 }
 0x1ea   :  { %v242_v39 = vpop.f32.mrb[2].mxu1 }
 0x1eb   :  { %v245_v40 = vmax.f32 %v240_v37, 0.0  ;;  %v561_v41 = vpop.f32.mrb[3].mxu1 }
 0x1ed   :  { %v246_v42 = vpack.c.bf16 %v245_v40, %v245_v40 }
 0x1ef   :  { %579 = vmatmul.mubr.bf16.vlgmr.msra.gmra.mrb[4].mxu0 %v246_v42 }
 0x2c2   :  { %v352_v46 = vpop.f32.mrb[4].mxu0 }
 0x2c3   :  { %v353_v47 = vadd.f32 %v489_v45, %v352_v46  ;;  %v580_v48 = vpop.f32.mrb[5].mxu0 }
 0x2c4   :  { %v355_v49 = vpop.f32.mrb[6].mxu0 }
 0x2c5   :  { %v358_v50 = vmax.f32 %v353_v47, 0.0  ;;  %v581_v51 = vpop.f32.mrb[7].mxu0 }
 0x2c7   :  { %v359_v52 = vpack.c.bf16 %v358_v50, %v358_v50 }
 0x2c9   :  { %599 = vmatmul.mubr.bf16.vlgmr.msra.gmra.mrb[4].mxu1 %v359_v52 }
 0x39c   :  { %v465_v54 = vpop.f32.mrb[4].mxu1 }
 0x39d   :  { %v466_v55 = vadd.f32 %v498_v53, %v465_v54  ;;  %v600_v56 = vpop.f32.mrb[5].mxu1 }
 0x39e   :  { %v468_v57 = vpop.f32.mrb[6].mxu1 }
 0x39f   :  { %471 = vst [vmem:[%s875_s9] sm:$0xff] %v466_v55  ;;  %v601_v58 = vpop.f32.mrb[7].mxu1 }
 0x3a0   :  { %476 = vsyncpa [#allocation3], 1 }
 0x3a1   :  { %477 = vsyncpa [#allocation5], 1 }

// kernel: mlp_forward.1
= control target key start
LH: loop header
LB: loop body
LE: loop exit
PB: predicated region body
PF: predicated region fallthrough
CT: control target
= control target key end

     0   :  { %14 = vsyncpa [#allocation3], 0  ;;  %s866_s0 = inlined_call_operand.vmem [shape: f32[8,8], index: 0, kind: input, shape index: {}]   ;;  %s867_s1 = inlined_call_operand.vmem [shape: bf16[8,128], index: 1, kind: input, shape index: {}]   ;;  %s868_s2 = inlined_call_operand.vmem [shape: f32[1,128], index: 2, kind: input, shape index: {}]   ;;  %s869_s3 = inlined_call_operand.hbm [shape: bf16[128,128], index: 3, kind: input, shape index: {}]   ;;  %s870_s4 = inlined_call_operand.vmem [shape: f32[1,128], index: 4, kind: input, shape index: {}]   ;;  %s871_s5 = inlined_call_operand.hbm [shape: bf16[128,128], index: 5, kind: input, shape index: {}]   ;;  %s872_s6 = inlined_call_operand.vmem [shape: f32[1,128], index: 6, kind: input, shape index: {}]   ;;  %s873_s7 = inlined_call_operand.hbm [shape: bf16[128,128], index: 7, kind: input, shape index: {}]   ;;  %s874_s8 = inlined_call_operand.vmem [shape: f32[1,128], index: 8, kind: input, shape index: {}]   ;;  %s875_s9 = inlined_call_operand.vmem [shape: f32[8,128], index: 9, kind: output, shape index: {}]  }
   0x1   :  { %15 = vsyncpa [#allocation5], 0  ;;  %s703_s30 = smov [#allocation4]   ;;  %s704_s11 = smov [#allocation2]  }
   0x2   :  { %s41_s10 = sshll.u32 %s703_s30, 4  ;;  %s27_s12 = sshll.u32 %s704_s11, 4  ;;  %s42_s10 = int_to_ptr.vmem [resolvable:$true] %s41_s10  ;;  %s760_s12 = int_to_ptr.vmem [resolvable:$true] %s27_s12 }
   0x3   :  { %s633_s15 = scalar_lea.hbm %s871_s5, 1024 }
   0x4   :  { %p634_p0 = scmp.ne.s32.totalorder %s871_s5, %s633_s15  ;;  %p637_p1 = scmp.lt.u32.totalorder %s633_s15, %s871_s5 }
   0x6   :  { %p639_p2 = pnand %p637_p1, %p634_p0 }
   0x8   :  { %642 = shalt.err (!%p639_p2)
}
   0x9   :  { %s643_s20 = scalar_lea.vmem %s42_s10, 1024  ;;  %p648_p4 = scmp.lt.s32.totalorder %s42_s10, %s42_s10 }
   0xa   :  { %p644_p3 = scmp.ne.s32.totalorder %s42_s10, %s643_s20  ;;  %p649_p5 = scmp.lt.s32.totalorder %s643_s20, %s643_s20 }
   0xc   :  { %p650_p6 = por %p649_p5, %p648_p4 }
   0xe   :  { %p651_p7 = pnand %p650_p6, %p644_p3 }
  0x10   :  { %654 = shalt.err (!%p651_p7)
}
  0x11   :  { %s705_s21 = smov 64   ;;  %s706_s22 = smov 4  }
  0x12   :  { %47 = dma.hbm_to_vmem [thread:$0]  %s871_s5, 1024, %s42_s10, [#allocation5], %s705_s21, %s705_s21, %s706_s22  }
  0x13   :  { %s655_s27 = scalar_lea.hbm %s869_s3, 1024 }
  0x14   :  { %p656_p8 = scmp.ne.s32.totalorder %s869_s3, %s655_s27  ;;  %p659_p9 = scmp.lt.u32.totalorder %s655_s27, %s869_s3 }
  0x16   :  { %p661_p10 = pnand %p659_p9, %p656_p8 }
  0x18   :  { %664 = shalt.err (!%p661_p10)
}
  0x19   :  { %s665_s13 = scalar_lea.vmem %s760_s12, 1024  ;;  %p670_p12 = scmp.lt.s32.totalorder %s760_s12, %s760_s12 }
  0x1a   :  { %p666_p11 = scmp.ne.s32.totalorder %s760_s12, %s665_s13  ;;  %p671_p13 = scmp.lt.s32.totalorder %s665_s13, %s665_s13 }
  0x1c   :  { %p672_p0 = por %p671_p13, %p670_p12 }
  0x1e   :  { %p673_p1 = pnand %p672_p0, %p666_p11 }
  0x20   :  { %676 = shalt.err (!%p673_p1)
}
  0x21   :  { %33 = dma.hbm_to_vmem [thread:$0]  %s869_s3, 1024, %s760_s12, [#allocation3], %s705_s21, %s705_s21, %s706_s22  }
  0x22   :  { %s707_s14 = smov [#allocation6]   ;;  %s677_s18 = scalar_lea.hbm %s873_s7, 1024 }
  0x23   :  { %s55_s15 = sshll.u32 %s707_s14, 4  ;;  %p678_p2 = scmp.ne.s32.totalorder %s873_s7, %s677_s18  ;;  %s56_s15 = int_to_ptr.vmem [resolvable:$true] %s55_s15 }
  0x24   :  { %p681_p3 = scmp.lt.u32.totalorder %s677_s18, %s873_s7 }
  0x26   :  { %p683_p4 = pnand %p681_p3, %p678_p2 }
  0x28   :  { %686 = shalt.err (!%p683_p4)
}
  0x29   :  { %s687_s25 = scalar_lea.vmem %s56_s15, 1024  ;;  %p692_p6 = scmp.lt.s32.totalorder %s56_s15, %s56_s15 }
  0x2a   :  { %p688_p5 = scmp.ne.s32.totalorder %s56_s15, %s687_s25  ;;  %p693_p7 = scmp.lt.s32.totalorder %s687_s25, %s687_s25 }
  0x2c   :  { %p694_p8 = por %p693_p7, %p692_p6 }
  0x2e   :  { %p695_p9 = pnand %p694_p8, %p688_p5 }
  0x30   :  { %698 = shalt.err (!%p695_p9)
}
  0x31   :  { %61 = dma.hbm_to_vmem [thread:$0]  %s873_s7, 1024, %s56_s15, [#allocation5], %s705_s21, %s705_s21, %s706_s22  }
  0x32   :  { %699 = dma.done.wait [#allocation3], 1024  }
  0x33   :  { %700 = vsyncadd [#allocation3], 4294966272 }
  0x34   :  { %701 = dma.done.wait [#allocation5], 2048  }
  0x35   :  { %702 = vsyncadd [#allocation5], 4294965248  ;;  %v708_v0 = vmov 0.0   ;;  %vm709_vm0 = vmmov 0   ;;  %vm88_vm1 = vcmask 1043456   ;;  %v74_v2 = vld [vmem:[%s866_s0] sm:$0xff] }
  0x36   :  { %536 = vmatprep.subr.bf16.mxu0 %v708_v0  ;;  %538 = vmatprep.mubr.msk.bf16.mxu0 %vm709_vm0, %v708_v0  ;;  %v76_v1 = vld [vmem:[%s867_s1] sm:$0xf]  ;;  %v75_v4 = vpack.c.bf16 %v74_v2, %v74_v2  ;;  %vm84_vm2 = vcmask 64512   ;;  %v610_v6 = vld [vmem:[#allocation2 + $0x8] sm:$0xff]   ;;  %v611_v7 = vld [vmem:[#allocation2 + $0x10] sm:$0xff]  }
  0x37   :  { %542 = vmatprep.subr.bf16.mxu1 %v708_v0  ;;  %558 = vmatprep.mubr.msk.bf16.mxu1 %vm709_vm0, %v708_v0  ;;  %v90_v3 = vsel %vm88_vm1, %v76_v1, 0  ;;  %v609_v5 = vld [vmem:[#allocation2] sm:$0xff]   ;;  %v612_v8 = vld [vmem:[#allocation2 + $0x18] sm:$0xff]   ;;  %v614_v10 = vld [vmem:[#allocation2 + $0x28] sm:$0xff]  }
  0x38   :  { %537 = vmatpush3.bf16.msra.mxu0 %v90_v3  ;;  %543 = vmatpush3.bf16.msra.mxu1 %v609_v5  ;;  %v613_v9 = vld [vmem:[#allocation2 + $0x20] sm:$0xff]   ;;  %v615_v11 = vld [vmem:[#allocation2 + $0x30] sm:$0xff]   ;;  %v616_v12 = vld [vmem:[#allocation2 + $0x38] sm:$0xff]  }
  0x39   :  { %562 = vmatprep.subr.bf16.mxu0 %v708_v0  ;;  %544 = vmatprep.subr.bf16.mxu1 %v708_v0  ;;  %v617_v13 = vld [vmem:[#allocation4] sm:$0xff]   ;;  %v618_v14 = vld [vmem:[#allocation4 + $0x8] sm:$0xff]   ;;  %v619_v15 = vld [vmem:[#allocation4 + $0x10] sm:$0xff]  }
  0x3a   :  { %v620_v16 = vld [vmem:[#allocation4 + $0x18] sm:$0xff]   ;;  %v621_v17 = vld [vmem:[#allocation4 + $0x20] sm:$0xff]   ;;  %v622_v18 = vld [vmem:[#allocation4 + $0x28] sm:$0xff]  }
  0x3b   :  { %539 = vmatmul.mubr.msk.bf16.vlgmr.msra.gmra.mrb[0].mxu0 %vm84_vm2, %v75_v4  ;;  %v478_v19 = vld [vmem:[%s868_s2] ss:$0 sm:$0xff]  ;;  %v623_v27 = vld [vmem:[#allocation4 + $0x30] sm:$0xff]   ;;  %v624_v28 = vld [vmem:[#allocation4 + $0x38] sm:$0xff]  }
  0x3c   :  { %578 = vmatprep.mubr.msk.bf16.mxu0 %vm709_vm0, %v708_v0  ;;  %545 = vmatpush3.bf16.msra.mxu1 %v610_v6  ;;  %v625_v29 = vld [vmem:[#allocation6] sm:$0xff]   ;;  %v626_v30 = vld [vmem:[#allocation6 + $0x8] sm:$0xff]   ;;  %v627_v31 = vld [vmem:[#allocation6 + $0x10] sm:$0xff]  }
  0x3d   :  { %546 = vmatprep.subr.bf16.mxu1 %v708_v0  ;;  %563 = vmatpush3.bf16.msra.mxu0 %v617_v13  ;;  %v628_v32 = vld [vmem:[#allocation6 + $0x18] sm:$0xff]   ;;  %v629_v33 = vld [vmem:[#allocation6 + $0x20] sm:$0xff]   ;;  %v630_v34 = vld [vmem:[#allocation6 + $0x28] sm:$0xff]  }
  0x3e   :  { %564 = vmatprep.subr.bf16.mxu0 %v708_v0  ;;  %v480_v35 = vld [vmem:[%s870_s4] ss:$0 sm:$0xff]  ;;  %v631_v43 = vld [vmem:[#allocation6 + $0x30] sm:$0xff]   ;;  %v632_v44 = vld [vmem:[#allocation6 + $0x38] sm:$0xff]  }
  0x3f   :  { %v489_v45 = vld [vmem:[%s872_s6] ss:$0 sm:$0xff] }
  0x40   :  { %547 = vmatpush3.bf16.msra.mxu1 %v611_v7  ;;  %v498_v53 = vld [vmem:[%s874_s8] ss:$0 sm:$0xff] }
  0x41   :  { %548 = vmatprep.subr.bf16.mxu1 %v708_v0  ;;  %565 = vmatpush3.bf16.msra.mxu0 %v618_v14 }
  0x42   :  { %566 = vmatprep.subr.bf16.mxu0 %v708_v0 }
  0x44   :  { %549 = vmatpush3.bf16.msra.mxu1 %v612_v8 }
  0x45   :  { %550 = vmatprep.subr.bf16.mxu1 %v708_v0  ;;  %567 = vmatpush3.bf16.msra.mxu0 %v619_v15 }
  0x46   :  { %568 = vmatprep.subr.bf16.mxu0 %v708_v0 }
  0x48   :  { %551 = vmatpush3.bf16.msra.mxu1 %v613_v9 }
  0x49   :  { %552 = vmatprep.subr.bf16.mxu1 %v708_v0  ;;  %569 = vmatpush3.bf16.msra.mxu0 %v620_v16 }
  0x4a   :  { %570 = vmatprep.subr.bf16.mxu0 %v708_v0 }
  0x4c   :  { %553 = vmatpush3.bf16.msra.mxu1 %v614_v10 }
  0x4d   :  { %554 = vmatprep.subr.bf16.mxu1 %v708_v0  ;;  %571 = vmatpush3.bf16.msra.mxu0 %v621_v17 }
  0x4e   :  { %572 = vmatprep.subr.bf16.mxu0 %v708_v0 }
  0x50   :  { %555 = vmatpush3.bf16.msra.mxu1 %v615_v11 }
  0x51   :  { %556 = vmatprep.subr.bf16.mxu1 %v708_v0  ;;  %573 = vmatpush3.bf16.msra.mxu0 %v622_v18 }
  0x52   :  { %574 = vmatprep.subr.bf16.mxu0 %v708_v0 }
  0x54   :  { %557 = vmatpush3.bf16.msra.mxu1 %v616_v12 }
  0x55   :  { %582 = vmatprep.subr.bf16.mxu1 %v708_v0  ;;  %575 = vmatpush3.bf16.msra.mxu0 %v623_v27 }
  0x56   :  { %576 = vmatprep.subr.bf16.mxu0 %v708_v0 }
  0x59   :  { %577 = vmatpush3.bf16.msra.mxu0 %v624_v28 }
 0x10e   :  { %v126_v20 = vpop.f32.mrb[0].mxu0 }
 0x10f   :  { %v127_v21 = vadd.f32 %v478_v19, %v126_v20  ;;  %v540_v22 = vpop.f32.mrb[1].mxu0 }
 0x110   :  { %v129_v23 = vpop.f32.mrb[2].mxu0 }
 0x111   :  { %v132_v24 = vmax.f32 %v127_v21, 0.0  ;;  %v541_v25 = vpop.f32.mrb[3].mxu0 }
 0x113   :  { %v133_v26 = vpack.c.bf16 %v132_v24, %v132_v24 }
 0x115   :  { %559 = vmatmul.mubr.bf16.vlgmr.msra.gmra.mrb[0].mxu1 %v133_v26 }
 0x116   :  { %598 = vmatprep.mubr.msk.bf16.mxu1 %vm709_vm0, %v708_v0  ;;  %583 = vmatpush3.bf16.msra.mxu1 %v625_v29 }
 0x117   :  { %584 = vmatprep.subr.bf16.mxu1 %v708_v0 }
 0x11a   :  { %585 = vmatpush3.bf16.msra.mxu1 %v626_v30 }
 0x11b   :  { %586 = vmatprep.subr.bf16.mxu1 %v708_v0 }
 0x11e   :  { %587 = vmatpush3.bf16.msra.mxu1 %v627_v31 }
 0x11f   :  { %588 = vmatprep.subr.bf16.mxu1 %v708_v0 }
 0x122   :  { %589 = vmatpush3.bf16.msra.mxu1 %v628_v32 }
 0x123   :  { %590 = vmatprep.subr.bf16.mxu1 %v708_v0 }
 0x126   :  { %591 = vmatpush3.bf16.msra.mxu1 %v629_v33 }
 0x127   :  { %592 = vmatprep.subr.bf16.mxu1 %v708_v0 }
 0x12a   :  { %593 = vmatpush3.bf16.msra.mxu1 %v630_v34 }
 0x12b   :  { %594 = vmatprep.subr.bf16.mxu1 %v708_v0 }
 0x12e   :  { %595 = vmatpush3.bf16.msra.mxu1 %v631_v43 }
 0x12f   :  { %596 = vmatprep.subr.bf16.mxu1 %v708_v0 }
 0x132   :  { %597 = vmatpush3.bf16.msra.mxu1 %v632_v44 }
 0x1e8   :  { %v239_v36 = vpop.f32.mrb[0].mxu1 }
 0x1e9   :  { %v240_v37 = vadd.f32 %v480_v35, %v239_v36  ;;  %v560_v38 = vpop.f32.mrb[1].mxu1 }
 0x1ea   :  { %v242_v39 = vpop.f32.mrb[2].mxu1 }
 0x1eb   :  { %v245_v40 = vmax.f32 %v240_v37, 0.0  ;;  %v561_v41 = vpop.f32.mrb[3].mxu1 }
 0x1ed   :  { %v246_v42 = vpack.c.bf16 %v245_v40, %v245_v40 }
 0x1ef   :  { %579 = vmatmul.mubr.bf16.vlgmr.msra.gmra.mrb[4].mxu0 %v246_v42 }
 0x2c2   :  { %v352_v46 = vpop.f32.mrb[4].mxu0 }
 0x2c3   :  { %v353_v47 = vadd.f32 %v489_v45, %v352_v46  ;;  %v580_v48 = vpop.f32.mrb[5].mxu0 }
 0x2c4   :  { %v355_v49 = vpop.f32.mrb[6].mxu0 }
 0x2c5   :  { %v358_v50 = vmax.f32 %v353_v47, 0.0  ;;  %v581_v51 = vpop.f32.mrb[7].mxu0 }
 0x2c7   :  { %v359_v52 = vpack.c.bf16 %v358_v50, %v358_v50 }
 0x2c9   :  { %599 = vmatmul.mubr.bf16.vlgmr.msra.gmra.mrb[4].mxu1 %v359_v52 }
 0x39c   :  { %v465_v54 = vpop.f32.mrb[4].mxu1 }
 0x39d   :  { %v466_v55 = vadd.f32 %v498_v53, %v465_v54  ;;  %v600_v56 = vpop.f32.mrb[5].mxu1 }
 0x39e   :  { %v468_v57 = vpop.f32.mrb[6].mxu1 }
 0x39f   :  { %471 = vst [vmem:[%s875_s9] sm:$0xff] %v466_v55  ;;  %v601_v58 = vpop.f32.mrb[7].mxu1 }
 0x3a0   :  { %476 = vsyncpa [#allocation3], 1 }
 0x3a1   :  { %477 = vsyncpa [#allocation5], 1 }

</bundles_post_ra>
